<compile_context>
chip_gen: v6e
topology: v6e:2x2x1
jax: 0.10.0
libtpu: 0.0.40
codegen_flags: <defaults>
</compile_context>

<pallas_src>
import jax
import jax.numpy as jnp
from jax.experimental import pallas as pl
from jax.experimental.pallas import tpu as pltpu


def _pointwise_conv_kernel(w_ref, b_ref, x_ref, o_ref):
    # w_ref: (Cout, Cin) f32 SMEM scalars
    # b_ref: (Cout,)     f32 SMEM scalars
    # x_ref: (1, Cin, TR, TL)  VMEM
    # o_ref: (1, Cout, TR, TL) VMEM
    cin = x_ref.shape[1]
    cout = o_ref.shape[1]

    # TODO(synk): for Cin and Cout both >= ~64-128 an MXU jnp.dot path would
    # beat this O(Cin*Cout) VPU FMA unroll; out-convs have tiny channels.
    for co in range(cout):
        acc = x_ref[0, 0].astype(jnp.float32) * w_ref[co, 0]
        for ci in range(1, cin):
            acc = acc + x_ref[0, ci].astype(jnp.float32) * w_ref[co, ci]
        # Store this output channel immediately: dense (TR, TL) slab,
        # no concat temporary, bounded live accumulators.
        o_ref[0, co] = (acc + b_ref[co]).astype(o_ref.dtype)


def _round_up(x, m):
    return ((x + m - 1) // m) * m


def _round_down(x, m):
    return (x // m) * m


def _spatial_layout(S):
    """Factor S into (R, L): rows x lanes, L a multiple of 128 when possible.

    Free contiguous reshape (no HBM traffic).  If S has no multiple-of-128
    factor, fall back to a single (1, S) row (lane dim == full array dim, so
    the (8,128) BlockSpec constraint is still satisfied)."""
    if S >= 128 and S % 128 == 0:
        L = _round_down(min(512, S), 128)
        while S % L != 0:
            L -= 128
        return S // L, L
    # TODO(synk): very large S with no 128-multiple factor would need a
    # masked lane-tiled path here; out-conv spatial sizes are 128-friendly.
    return 1, S


def _select_tiles(N, Cin, Cout, R, L):
    """Pick (tile_rows, tile_lanes, vmem_limit_bytes) from a VMEM budget."""
    try:
        vmem_cap = int(pltpu.get_tpu_info().vmem_capacity_bytes)
    except Exception:
        vmem_cap = 64 * 1024 * 1024  # conservative: v7x per-TC capacity

    # Raise the scoped VMEM limit (defaults: 16 MiB v5e / 32 MiB v6e, v7x).
    vmem_limit = min(96 * 1024 * 1024, (vmem_cap * 3) // 4)
    # Budget for the double-buffered in+out blocks; rest is headroom for the
    # f32 accumulator temporaries and compiler scratch.
    block_budget = (vmem_limit * 3) // 5
    per_spatial_elem_bytes = 2 * (Cin + Cout) * 4  # 2 pipeline bufs, f32
    max_spatial_elems = max(8 * 128, block_budget // per_spatial_elem_bytes)

    # Keep the grid at >= 4 total steps so both v7x TensorCores get work and
    # double-buffering can overlap.
    min_steps = 4
    want_sp_tiles = max(1, -(-min_steps // N))

    if R > 1:
        tl = L  # full lane extent (<= 512)
        tr = max_spatial_elems // L
        cap = _round_up(-(-R // want_sp_tiles), 8)
        tr = min(tr, cap)
        if tr >= R:
            tr = R
        else:
            tr = max(8, _round_down(tr, 8))
            if tr >= R:
                tr = R
    else:
        tr = 1  # rows dim is a singleton (== full extent)
        if L % 128 == 0 and L > 128:
            tl = _round_down(min(max_spatial_elems, L), 128)
            cap = _round_up(-(-L // want_sp_tiles), 128)
            tl = max(128, min(tl, cap))
            if tl >= L:
                tl = L
        else:
            tl = L
    return tr, tl, int(vmem_limit)


def out_convolution(x, weight, bias, *, tile_rows=None, tile_lanes=None):
    """1x1x1 Conv3d forward.

    x:      (N, Cin, D, H, W)    float32
    weight: (Cout, Cin, 1, 1, 1) float32 (PyTorch Conv3d layout)
    bias:   (Cout,)              float32
    returns (N, Cout, D, H, W)   float32
    """
    N, Cin, D, H, W = x.shape
    Cout = weight.shape[0]
    S = D * H * W

    R, L = _spatial_layout(S)

    # Free reshapes only -- no transposes, no pads.
    x_r = x.reshape(N, Cin, R, L)
    w_mat = weight.reshape(Cout, Cin).astype(jnp.float32)
    b_vec = bias.astype(jnp.float32)

    tr_auto, tl_auto, vmem_limit = _select_tiles(N, Cin, Cout, R, L)
    tr = tr_auto if tile_rows is None else int(tile_rows)
    tl = tl_auto if tile_lanes is None else int(tile_lanes)
    if tile_rows is not None:
        assert tr == R or (0 < tr <= R and tr % 8 == 0), (
            "tile_rows must equal R or be a positive multiple of 8 <= R")
    if tile_lanes is not None:
        assert tl == L or (0 < tl <= L and tl % 128 == 0), (
            "tile_lanes must equal L or be a positive multiple of 128 <= L")

    # cdiv grid: non-dividing tiles get a masked boundary block (pointwise op,
    # so padded reads only feed masked writes) -- no silent tail truncation.
    grid = (N, pl.cdiv(R, tr), pl.cdiv(L, tl))

    out = pl.pallas_call(
        _pointwise_conv_kernel,
        out_shape=jax.ShapeDtypeStruct((N, Cout, R, L), x.dtype),
        grid_spec=pltpu.PrefetchScalarGridSpec(
            num_scalar_prefetch=0,
            grid=grid,
            in_specs=[
                pl.BlockSpec(memory_space=pltpu.MemorySpace.SMEM),  # weight
                pl.BlockSpec(memory_space=pltpu.MemorySpace.SMEM),  # bias
                pl.BlockSpec((1, Cin, tr, tl), lambda n, r, c: (n, 0, r, c)),
            ],
            out_specs=pl.BlockSpec((1, Cout, tr, tl),
                                   lambda n, r, c: (n, 0, r, c)),
        ),
        compiler_params=pltpu.CompilerParams(
            dimension_semantics=("parallel", "parallel", "parallel"),
            vmem_limit_bytes=vmem_limit,
        ),
    )(w_mat, b_vec, x_r)

    return out.reshape(N, Cout, D, H, W)


if __name__ == "__main__":
    # Small shapes consistent with Conv3d forward: (N, Cin, D, H, W)
    N, Cin, Cout, D, H, W = 2, 4, 3, 4, 8, 8

    key = jax.random.PRNGKey(0)
    kx, kw, kb = jax.random.split(key, 3)

    x = jax.random.normal(kx, (N, Cin, D, H, W), dtype=jnp.float32)

    # PyTorch-style init: U(-1/sqrt(fan_in), 1/sqrt(fan_in)), fan_in = Cin.
    bound = 1.0 / jnp.sqrt(jnp.float32(Cin))
    weight = jax.random.uniform(kw, (Cout, Cin, 1, 1, 1),
                                minval=-bound, maxval=bound, dtype=jnp.float32)
    bias = jax.random.uniform(kb, (Cout,),
                              minval=-bound, maxval=bound, dtype=jnp.float32)

    out = out_convolution(x, weight, bias)
    out = jax.block_until_ready(out)

    # Reference check against plain-JAX pointwise conv.
    ref = jnp.einsum("ncdhw,oc->nodhw", x, weight.reshape(Cout, Cin)) \
          + bias.reshape(1, Cout, 1, 1, 1)
    assert out.shape == (N, Cout, D, H, W)
    assert jnp.allclose(out, ref, atol=1e-5, rtol=1e-5)

    print("KERNEL_OK")
</pallas_src>

<mosaic_0001>
module attributes {stable_mosaic.version = 11 : i64} {
  func.func @_pointwise_conv_kernel(%arg0: i32, %arg1: i32, %arg2: i32, %arg3: memref<3x4xf32, #tpu.memory_space<smem>>, %arg4: memref<3xf32, #tpu.memory_space<smem>>, %arg5: memref<1x4x1x128xf32, #tpu.memory_space<vmem>>, %arg6: memref<1x3x1x128xf32, #tpu.memory_space<vmem>>) attributes {dimension_semantics = [#tpu.dimension_semantics<parallel>, #tpu.dimension_semantics<parallel>, #tpu.dimension_semantics<parallel>], iteration_bounds = array<i64: 2, 1, 2>, scalar_prefetch = 0 : i64, scratch_operands = 0 : i64, tpu.core_type = #tpu.core_type<tc>, window_params = [{transform_indices = @transform_0, window_bounds = array<i64: 3, 4>}, {transform_indices = @transform_1, window_bounds = array<i64: 3>}, {transform_indices = @transform_2, window_bounds = array<i64: 1, 4, 1, 128>}, {transform_indices = @transform_3, window_bounds = array<i64: 1, 3, 1, 128>}]} {
    %c0 = arith.constant 0 : index
    %c0_0 = arith.constant 0 : index
    %c0_1 = arith.constant 0 : index
    %c0_2 = arith.constant 0 : index
    %0 = vector.load %arg5[%c0, %c0_0, %c0_1, %c0_2] : memref<1x4x1x128xf32, #tpu.memory_space<vmem>>, vector<1x1x1x128xf32>
    %1 = vector.shape_cast %0 : vector<1x1x1x128xf32> to vector<1x128xf32>
    %c0_3 = arith.constant 0 : index
    %c0_4 = arith.constant 0 : index
    %2 = memref.load %arg3[%c0_3, %c0_4] : memref<3x4xf32, #tpu.memory_space<smem>>
    %3 = vector.broadcast %2 : f32 to vector<1x128xf32>
    %4 = arith.mulf %1, %3 : vector<1x128xf32>
    %c0_5 = arith.constant 0 : index
    %c1 = arith.constant 1 : index
    %c0_6 = arith.constant 0 : index
    %c0_7 = arith.constant 0 : index
    %5 = vector.load %arg5[%c0_5, %c1, %c0_6, %c0_7] : memref<1x4x1x128xf32, #tpu.memory_space<vmem>>, vector<1x1x1x128xf32>
    %6 = vector.shape_cast %5 : vector<1x1x1x128xf32> to vector<1x128xf32>
    %c0_8 = arith.constant 0 : index
    %c1_9 = arith.constant 1 : index
    %7 = memref.load %arg3[%c0_8, %c1_9] : memref<3x4xf32, #tpu.memory_space<smem>>
    %8 = vector.broadcast %7 : f32 to vector<1x128xf32>
    %9 = arith.mulf %6, %8 : vector<1x128xf32>
    %10 = arith.addf %4, %9 : vector<1x128xf32>
    %c0_10 = arith.constant 0 : index
    %c2 = arith.constant 2 : index
    %c0_11 = arith.constant 0 : index
    %c0_12 = arith.constant 0 : index
    %11 = vector.load %arg5[%c0_10, %c2, %c0_11, %c0_12] : memref<1x4x1x128xf32, #tpu.memory_space<vmem>>, vector<1x1x1x128xf32>
    %12 = vector.shape_cast %11 : vector<1x1x1x128xf32> to vector<1x128xf32>
    %c0_13 = arith.constant 0 : index
    %c2_14 = arith.constant 2 : index
    %13 = memref.load %arg3[%c0_13, %c2_14] : memref<3x4xf32, #tpu.memory_space<smem>>
    %14 = vector.broadcast %13 : f32 to vector<1x128xf32>
    %15 = arith.mulf %12, %14 : vector<1x128xf32>
    %16 = arith.addf %10, %15 : vector<1x128xf32>
    %c0_15 = arith.constant 0 : index
    %c3 = arith.constant 3 : index
    %c0_16 = arith.constant 0 : index
    %c0_17 = arith.constant 0 : index
    %17 = vector.load %arg5[%c0_15, %c3, %c0_16, %c0_17] : memref<1x4x1x128xf32, #tpu.memory_space<vmem>>, vector<1x1x1x128xf32>
    %18 = vector.shape_cast %17 : vector<1x1x1x128xf32> to vector<1x128xf32>
    %c0_18 = arith.constant 0 : index
    %c3_19 = arith.constant 3 : index
    %19 = memref.load %arg3[%c0_18, %c3_19] : memref<3x4xf32, #tpu.memory_space<smem>>
    %20 = vector.broadcast %19 : f32 to vector<1x128xf32>
    %21 = arith.mulf %18, %20 : vector<1x128xf32>
    %22 = arith.addf %16, %21 : vector<1x128xf32>
    %c0_20 = arith.constant 0 : index
    %23 = memref.load %arg4[%c0_20] : memref<3xf32, #tpu.memory_space<smem>>
    %24 = vector.broadcast %23 : f32 to vector<1x128xf32>
    %25 = arith.addf %22, %24 : vector<1x128xf32>
    %c0_21 = arith.constant 0 : index
    %c0_22 = arith.constant 0 : index
    %c0_23 = arith.constant 0 : index
    %c0_24 = arith.constant 0 : index
    %26 = vector.load %arg6[%c0_21, %c0_22, %c0_23, %c0_24] : memref<1x3x1x128xf32, #tpu.memory_space<vmem>>, vector<1x1x1x128xf32>
    %27 = vector.shape_cast %26 : vector<1x1x1x128xf32> to vector<1x128xf32>
    %28 = vector.shape_cast %25 : vector<1x128xf32> to vector<1x1x1x128xf32>
    tpu.vector_store %arg6[%c0_21, %c0_22, %c0_23, %c0_24], %28 {strides = array<i32>} : memref<1x3x1x128xf32, #tpu.memory_space<vmem>>, vector<1x1x1x128xf32>,
    %c0_25 = arith.constant 0 : index
    %c0_26 = arith.constant 0 : index
    %c0_27 = arith.constant 0 : index
    %c0_28 = arith.constant 0 : index
    %29 = vector.load %arg5[%c0_25, %c0_26, %c0_27, %c0_28] : memref<1x4x1x128xf32, #tpu.memory_space<vmem>>, vector<1x1x1x128xf32>
    %30 = vector.shape_cast %29 : vector<1x1x1x128xf32> to vector<1x128xf32>
    %c1_29 = arith.constant 1 : index
    %c0_30 = arith.constant 0 : index
    %31 = memref.load %arg3[%c1_29, %c0_30] : memref<3x4xf32, #tpu.memory_space<smem>>
    %32 = vector.broadcast %31 : f32 to vector<1x128xf32>
    %33 = arith.mulf %30, %32 : vector<1x128xf32>
    %c0_31 = arith.constant 0 : index
    %c1_32 = arith.constant 1 : index
    %c0_33 = arith.constant 0 : index
    %c0_34 = arith.constant 0 : index
    %34 = vector.load %arg5[%c0_31, %c1_32, %c0_33, %c0_34] : memref<1x4x1x128xf32, #tpu.memory_space<vmem>>, vector<1x1x1x128xf32>
    %35 = vector.shape_cast %34 : vector<1x1x1x128xf32> to vector<1x128xf32>
    %c1_35 = arith.constant 1 : index
    %c1_36 = arith.constant 1 : index
    %36 = memref.load %arg3[%c1_35, %c1_36] : memref<3x4xf32, #tpu.memory_space<smem>>
    %37 = vector.broadcast %36 : f32 to vector<1x128xf32>
    %38 = arith.mulf %35, %37 : vector<1x128xf32>
    %39 = arith.addf %33, %38 : vector<1x128xf32>
    %c0_37 = arith.constant 0 : index
    %c2_38 = arith.constant 2 : index
    %c0_39 = arith.constant 0 : index
    %c0_40 = arith.constant 0 : index
    %40 = vector.load %arg5[%c0_37, %c2_38, %c0_39, %c0_40] : memref<1x4x1x128xf32, #tpu.memory_space<vmem>>, vector<1x1x1x128xf32>
    %41 = vector.shape_cast %40 : vector<1x1x1x128xf32> to vector<1x128xf32>
    %c1_41 = arith.constant 1 : index
    %c2_42 = arith.constant 2 : index
    %42 = memref.load %arg3[%c1_41, %c2_42] : memref<3x4xf32, #tpu.memory_space<smem>>
    %43 = vector.broadcast %42 : f32 to vector<1x128xf32>
    %44 = arith.mulf %41, %43 : vector<1x128xf32>
    %45 = arith.addf %39, %44 : vector<1x128xf32>
    %c0_43 = arith.constant 0 : index
    %c3_44 = arith.constant 3 : index
    %c0_45 = arith.constant 0 : index
    %c0_46 = arith.constant 0 : index
    %46 = vector.load %arg5[%c0_43, %c3_44, %c0_45, %c0_46] : memref<1x4x1x128xf32, #tpu.memory_space<vmem>>, vector<1x1x1x128xf32>
    %47 = vector.shape_cast %46 : vector<1x1x1x128xf32> to vector<1x128xf32>
    %c1_47 = arith.constant 1 : index
    %c3_48 = arith.constant 3 : index
    %48 = memref.load %arg3[%c1_47, %c3_48] : memref<3x4xf32, #tpu.memory_space<smem>>
    %49 = vector.broadcast %48 : f32 to vector<1x128xf32>
    %50 = arith.mulf %47, %49 : vector<1x128xf32>
    %51 = arith.addf %45, %50 : vector<1x128xf32>
    %c1_49 = arith.constant 1 : index
    %52 = memref.load %arg4[%c1_49] : memref<3xf32, #tpu.memory_space<smem>>
    %53 = vector.broadcast %52 : f32 to vector<1x128xf32>
    %54 = arith.addf %51, %53 : vector<1x128xf32>
    %c0_50 = arith.constant 0 : index
    %c1_51 = arith.constant 1 : index
    %c0_52 = arith.constant 0 : index
    %c0_53 = arith.constant 0 : index
    %55 = vector.load %arg6[%c0_50, %c1_51, %c0_52, %c0_53] : memref<1x3x1x128xf32, #tpu.memory_space<vmem>>, vector<1x1x1x128xf32>
    %56 = vector.shape_cast %55 : vector<1x1x1x128xf32> to vector<1x128xf32>
    %57 = vector.shape_cast %54 : vector<1x128xf32> to vector<1x1x1x128xf32>
    tpu.vector_store %arg6[%c0_50, %c1_51, %c0_52, %c0_53], %57 {strides = array<i32>} : memref<1x3x1x128xf32, #tpu.memory_space<vmem>>, vector<1x1x1x128xf32>,
    %c0_54 = arith.constant 0 : index
    %c0_55 = arith.constant 0 : index
    %c0_56 = arith.constant 0 : index
    %c0_57 = arith.constant 0 : index
    %58 = vector.load %arg5[%c0_54, %c0_55, %c0_56, %c0_57] : memref<1x4x1x128xf32, #tpu.memory_space<vmem>>, vector<1x1x1x128xf32>
    %59 = vector.shape_cast %58 : vector<1x1x1x128xf32> to vector<1x128xf32>
    %c2_58 = arith.constant 2 : index
    %c0_59 = arith.constant 0 : index
    %60 = memref.load %arg3[%c2_58, %c0_59] : memref<3x4xf32, #tpu.memory_space<smem>>
    %61 = vector.broadcast %60 : f32 to vector<1x128xf32>
    %62 = arith.mulf %59, %61 : vector<1x128xf32>
    %c0_60 = arith.constant 0 : index
    %c1_61 = arith.constant 1 : index
    %c0_62 = arith.constant 0 : index
    %c0_63 = arith.constant 0 : index
    %63 = vector.load %arg5[%c0_60, %c1_61, %c0_62, %c0_63] : memref<1x4x1x128xf32, #tpu.memory_space<vmem>>, vector<1x1x1x128xf32>
    %64 = vector.shape_cast %63 : vector<1x1x1x128xf32> to vector<1x128xf32>
    %c2_64 = arith.constant 2 : index
    %c1_65 = arith.constant 1 : index
    %65 = memref.load %arg3[%c2_64, %c1_65] : memref<3x4xf32, #tpu.memory_space<smem>>
    %66 = vector.broadcast %65 : f32 to vector<1x128xf32>
    %67 = arith.mulf %64, %66 : vector<1x128xf32>
    %68 = arith.addf %62, %67 : vector<1x128xf32>
    %c0_66 = arith.constant 0 : index
    %c2_67 = arith.constant 2 : index
    %c0_68 = arith.constant 0 : index
    %c0_69 = arith.constant 0 : index
    %69 = vector.load %arg5[%c0_66, %c2_67, %c0_68, %c0_69] : memref<1x4x1x128xf32, #tpu.memory_space<vmem>>, vector<1x1x1x128xf32>
    %70 = vector.shape_cast %69 : vector<1x1x1x128xf32> to vector<1x128xf32>
    %c2_70 = arith.constant 2 : index
    %c2_71 = arith.constant 2 : index
    %71 = memref.load %arg3[%c2_70, %c2_71] : memref<3x4xf32, #tpu.memory_space<smem>>
    %72 = vector.broadcast %71 : f32 to vector<1x128xf32>
    %73 = arith.mulf %70, %72 : vector<1x128xf32>
    %74 = arith.addf %68, %73 : vector<1x128xf32>
    %c0_72 = arith.constant 0 : index
    %c3_73 = arith.constant 3 : index
    %c0_74 = arith.constant 0 : index
    %c0_75 = arith.constant 0 : index
    %75 = vector.load %arg5[%c0_72, %c3_73, %c0_74, %c0_75] : memref<1x4x1x128xf32, #tpu.memory_space<vmem>>, vector<1x1x1x128xf32>
    %76 = vector.shape_cast %75 : vector<1x1x1x128xf32> to vector<1x128xf32>
    %c2_76 = arith.constant 2 : index
    %c3_77 = arith.constant 3 : index
    %77 = memref.load %arg3[%c2_76, %c3_77] : memref<3x4xf32, #tpu.memory_space<smem>>
    %78 = vector.broadcast %77 : f32 to vector<1x128xf32>
    %79 = arith.mulf %76, %78 : vector<1x128xf32>
    %80 = arith.addf %74, %79 : vector<1x128xf32>
    %c2_78 = arith.constant 2 : index
    %81 = memref.load %arg4[%c2_78] : memref<3xf32, #tpu.memory_space<smem>>
    %82 = vector.broadcast %81 : f32 to vector<1x128xf32>
    %83 = arith.addf %80, %82 : vector<1x128xf32>
    %c0_79 = arith.constant 0 : index
    %c2_80 = arith.constant 2 : index
    %c0_81 = arith.constant 0 : index
    %c0_82 = arith.constant 0 : index
    %84 = vector.load %arg6[%c0_79, %c2_80, %c0_81, %c0_82] : memref<1x3x1x128xf32, #tpu.memory_space<vmem>>, vector<1x1x1x128xf32>
    %85 = vector.shape_cast %84 : vector<1x1x1x128xf32> to vector<1x128xf32>
    %86 = vector.shape_cast %83 : vector<1x128xf32> to vector<1x1x1x128xf32>
    tpu.vector_store %arg6[%c0_79, %c2_80, %c0_81, %c0_82], %86 {strides = array<i32>} : memref<1x3x1x128xf32, #tpu.memory_space<vmem>>, vector<1x1x1x128xf32>,
    return
  }
  func.func @transform_0(%arg0: i32, %arg1: i32, %arg2: i32) -> (i32, i32) {
    %c0_i32 = arith.constant 0 : i32
    %c0_i32_0 = arith.constant 0 : i32
    %c0_i32_1 = arith.constant 0 : i32
    return %c0_i32, %c0_i32_0 : i32, i32
  }
  func.func @transform_1(%arg0: i32, %arg1: i32, %arg2: i32) -> i32 {
    %c0_i32 = arith.constant 0 : i32
    %c0_i32_0 = arith.constant 0 : i32
    return %c0_i32 : i32
  }
  func.func @transform_2(%arg0: i32, %arg1: i32, %arg2: i32) -> (i32, i32, i32, i32) {
    %c0_i32 = arith.constant 0 : i32
    %c0_i32_0 = arith.constant 0 : i32
    return %arg0, %c0_i32, %arg1, %arg2 : i32, i32, i32, i32
  }
  func.func @transform_3(%arg0: i32, %arg1: i32, %arg2: i32) -> (i32, i32, i32, i32) {
    %c0_i32 = arith.constant 0 : i32
    %c0_i32_0 = arith.constant 0 : i32
    return %arg0, %c0_i32, %arg1, %arg2 : i32, i32, i32, i32
  }
}

</mosaic_0001>

<bundles_post_ra>
// kernel: tpu_custom_call.1
= control target key start
LH: loop header
LB: loop body
LE: loop exit
PB: predicated region body
PF: predicated region fallthrough
CT: control target
= control target key end

     0   :  { %s1019_s0 = inlined_call_operand.hbm [shape: f32[3,4], index: 0, kind: input, shape index: {}]   ;;  %s1020_s1 = inlined_call_operand.vmem [shape: f32[3], index: 1, kind: input, shape index: {}]   ;;  %s1021_s2 = inlined_call_operand.hbm [shape: f32[2,4,1,256], index: 2, kind: input, shape index: {}]   ;;  %s1022_s3 = inlined_call_operand.hbm [shape: f32[2,3,1,256], index: 3, kind: output, shape index: {}]  }
   0x1   :  { %1026 = sst [smem:[#allocation17_spill]] %s1019_s0 }
   0x2   :  { %1027 = sst [smem:[#allocation18_spill]] %s1020_s1 }
   0x3   :  { %8 = vsyncpa [#allocation5], 0 }
   0x4   :  { %9 = vsyncpa [#allocation6], 0 }
   0x5   :  { %10 = vsyncpa [#allocation3], 0 }
   0x6   :  { %12 = vsyncpa [#allocation3 + $0x1], 0 }
   0x7   :  { %13 = vsyncpa [#allocation4], 0 }
   0x8   :  { %15 = vsyncpa [#allocation4 + $0x1], 0  ;;  %s791_s12 = smov 0   ;;  %s793_s13 = smov 0  }
   0x9   :  { %s795_s14 = smov 0   ;;  %s797_s15 = smov 0  }
   0xa   :  { %s799_s16 = smov 0   ;;  %s801_s17 = smov 0  }
   0xb   :  { %s803_s18 = smov 0   ;;  %s805_s19 = smov 0  }
   0xc LB: > { %1028 = sst [smem:[#allocation14_spill]] %s731_s12  ;;  %s454_s20 = sadd.s32 4294967295, %s759_s19   ;;  %s759_s19 = sphi %s805_s19, %s21_s19   ;;  %s755_s18 = sphi %s803_s18, %s1052_s18   ;;  %s751_s17 = sphi %s801_s17, %s1051_s17   ;;  %s747_s16 = sphi %s799_s16, %s1050_s16   ;;  %s743_s15 = sphi %s797_s15, %s1049_s15   ;;  %s739_s14 = sphi %s795_s14, %s1048_s14   ;;  %s735_s13 = sphi %s793_s13, %s1047_s13   ;;  %s731_s12 = sphi %s791_s12, %s1046_s12  }
   0xd   : > { %s455_s21 = sadd.s32 4294967294, %s759_s19   ;;  %p100_p0 = scmp.ne.s32.totalorder %s739_s14, %s735_s13 }
   0xe   : > { %p101_p1 = scmp.eq.s32.totalorder %s759_s19, 0  ;;  %p106_p2 = scmp.ne.s32.totalorder %s735_s13, %s731_s12 }
   0xf   : > { %p839_p3 = scmp.eq.s32.totalorder %s454_s20, 0  ;;  %p134_p4 = scmp.eq.s32.totalorder %s454_s20, 3 }
  0x10   : > { %p102_p5 = por %p101_p1, %p100_p0  ;;  %p140_p6 = scmp.eq.s32.totalorder %s455_s21, 3 }
  0x11   : > { %p845_p7 = por %p839_p3, %p106_p2  ;;  %p849_p8 = por %p134_p4, %p100_p0 }
  0x12   : > { %p853_p9 = por %p140_p6, %p106_p2  ;;  %p456_p10 = scmp.ge.s32.totalorder %s759_s19, 1 }
  0x13   : > { %p147_p11 = scmp.lt.s32.totalorder %s759_s19, 5  ;;  %p525_p13 = scmp.lt.s32.totalorder %s759_s19, 4 }
  0x14   : > { %s1032_s26 = scalar_select %p853_p9, 1, 0 }
  0x15   : > { %p859_p12 = pnand %p456_p10, %p147_p11  ;;  %s1035_s1 = sld [smem:[#allocation18_spill]] }
  0x16   : > { %1033 = sst [smem:[#allocation15_spill]] %s1032_s26  ;;  %p869_p1 = pnand %p525_p13, %p102_p5 }
  0x17   : > { %p508_p0 = pneg %p859_p12  ;;  %s761_s6 = smov [#allocation2]  }
  0x18   : > { %s1038_s0 = sld [smem:[#allocation17_spill]] }
  0x19   : > { %p875_p2 = pnand %p508_p0, %p839_p3 }
  0x1b   : > { %s169_s30 = sshll.u32 %s1035_s1, 4  ;;  %p614_p5 = pneg %p875_p2  ;;  %s170_s30 = int_to_ptr.vmem [resolvable:$true] %s169_s30 }
  0x1c   : > { %s612_s9 = scalar_lea.vmem %s170_s30, 16  ;;  %p620_p11 = scmp.lt.s32.totalorder %s170_s30, %s170_s30 }
  0x1d   : > { %p613_p4 = scmp.ne.s32.totalorder %s170_s30, %s612_s9  ;;  %p621_p13 = scmp.lt.s32.totalorder %s612_s9, %s612_s9 }
  0x1e   : > { %511 = dma.hbm_to_smem (!%p875_p2), %s1038_s0, 64, %s761_s6, [#allocation5]  }
  0x1f   : > { %p615_p6 = pnand %p614_p5, %p613_p4  ;;  %p622_p0 = por %p621_p13, %p620_p11 }
  0x21   : > { %p616_p10 = pneg %p615_p6 }
  0x23   : > { %p623_p9 = pnand %p622_p0, %p616_p10 }
  0x25   : > { %626 = shalt.err (!%p623_p9)
}
  0x26   : > { %s762_s10 = smov [#allocation7]   ;;  %s33_s11 = sadd.s32 1, %s751_s17 }
  0x27   : > { %514 = dma.vmem_to_smem (!%p875_p2), %s170_s30, 16, %s762_s10, [#allocation6]  }
  0x28   : > { %s40_s20 = sadd.s32 1, %s755_s18  ;;  %p34_p4 = scmp.ge.s32.totalorder %s33_s11, 2 }
  0x29   : > { %s180_s21 = sand.u32 1, %s739_s14   ;;  %s461_s5 = sshll.u32 %s755_s18, 3 }
  0x2a   : > { %s460_s28 = sshll.u32 %s180_s21, 2  ;;  %s1054_s11 = smov (%p34_p4, %s33_s11), 0 }
  0x2b   : > { %1039 = sst [smem:[#allocation16_spill]] %s1054_s11  ;;  %s1056_s20 = smov (!%p34_p4, %s40_s20), %s755_s18 }
  0x2c   : > { %s89_s29 = ssub.s32 %s751_s17, %s1054_s11  ;;  %p42_p9 = scmp.ge.s32.totalorder %s1056_s20, 2 }
  0x2d   : > { %s191_s6 = sadd.s32 %s751_s17, %s461_s5  ;;  %s184_s7 = scalar_lea.vmem [#allocation8], %s460_s28 }
  0x2e   : > { %s194_s8 = sshll.u32 %s184_s7, 4  ;;  %s1058_s20 = smov (%p42_p9, %s1056_s20), 0  ;;  %s195_s8 = int_to_ptr.vmem [resolvable:$true] %s194_s8 }
  0x2f   : > { %s462_s30 = sshll.u32 %s191_s6, 4  ;;  %s86_s9 = ssub.s32 %s755_s18, %s1058_s20 }
  0x30   : > { %s193_s0 = scalar_lea.hbm %s1021_s2, %s462_s30  ;;  %s90_s1 = sor.u32 %s89_s29, %s86_s9 }
  0x31   : > { %p91_p2 = scmp.eq.s32.totalorder %s90_s1, 0  ;;  %s1040_s26 = sadd.s32 1, %s739_s14 }
  0x32   : > { %s181_s11 = scalar_lea.sflag [#allocation3], %s180_s21  ;;  %p629_p5 = pneg %p869_p1 }
  0x33   : > { %s908_s12 = scalar_select %p91_p2, %s739_s14, %s1040_s26  }
  0x34   : > { %s640_s28 = scalar_lea.vmem %s195_s8, 64  ;;  %s763_s5 = smov [#allocation8]  }
  0x35   : > { %p641_p6 = scmp.ne.s32.totalorder %s195_s8, %s640_s28  ;;  %s645_s6 = sshll.u32 %s763_s5, 4  ;;  %s646_s6 = int_to_ptr.vmem [resolvable:$false] %s645_s6 }
  0x36   : > { %s647_s7 = scalar_lea.vmem %s646_s6, 128  ;;  %p648_p13 = scmp.lt.s32.totalorder %s195_s8, %s646_s6 }
  0x37   : > { %p643_p10 = pnand %p641_p6, %p629_p5  ;;  %p649_p0 = scmp.lt.s32.totalorder %s647_s7, %s640_s28 }
  0x39   : > { %p644_p11 = pneg %p643_p10  ;;  %p650_p4 = por %p649_p0, %p648_p13 }
  0x3b   : > { %p651_p9 = pnand %p650_p4, %p644_p11 }
  0x3d   : > { %654 = shalt.err (!%p651_p9)
}
  0x3e   : > { %s764_s1 = smov 32   ;;  %s765_s22 = smov 16  }
  0x3f   : > { %s766_s26 = smov 1   ;;  %206 = sbr.rel (%p859_p12) target bundleno = 120 (0x78), region = 32 }
  0x40   : > { %518 = dma.hbm_to_vmem [thread:$0]  (!%p869_p1), %s193_s0, 64, %s195_s8, %s181_s11, %s764_s1, %s765_s22, %s766_s26  }
  0x44   : > { %714 = dma.done.wait (%p839_p3), [#allocation5], 64  }
  0x45   : > { %716 = vsyncadd (%p839_p3), [#allocation5], 4294967232 }
  0x46   : > { %718 = dma.done.wait (%p839_p3), [#allocation6], 16  }
  0x47   : > { %720 = vsyncadd (%p839_p3), [#allocation6], 4294967280  ;;  %s925_s21 = sand.u32 1, %s735_s13  }
  0x48   : > { %s466_s0 = sshll.u32 %s925_s21, 2  ;;  %s217_s27 = scalar_lea.sflag [#allocation3], %s925_s21 }
  0x49   : > { %s929_s4 = scalar_lea.vmem [#allocation8], %s466_s0 }
  0x4a   : > { %722 = dma.done.wait (%p845_p7), %s217_s27, 64  }
  0x4b   : > { %724 = vsyncadd (%p845_p7), %s217_s27, 4294967232 }
  0x4c   : > { %225 = sfence }
  0x4d   : > { %s245_s11 = sld [smem:[#allocation2]]  ;;  %v244_v0 = vld [vmem:[%s929_s4] sm:$0x1]  ;;  %v467_v1 = vld [vmem:[%s929_s4 + $0x1] sm:$0x1]  ;;  %s494_s6 = smul.u32 3, %s925_s21 }
  0x4e   : > { %s468_s23 = sld [smem:[#allocation2 + $0x1]]  ;;  %v469_v3 = vld [vmem:[%s929_s4 + $0x2] sm:$0x1]  ;;  %v471_v6 = vld [vmem:[%s929_s4 + $0x3] sm:$0x1]  ;;  %s495_s27 = smul.u32 6, %s747_s16 }
  0x4f   : > { %s470_s29 = sld [smem:[#allocation2 + $0x2]]  ;;  %v270_v11 = vld [vmem:[%s929_s4] sm:$0x1]  ;;  %v474_v14 = vld [vmem:[%s929_s4 + $0x1] sm:$0x1] }
  0x50   : > { %s472_s8 = sld [smem:[#allocation2 + $0x3]]  ;;  %v476_v16 = vld [vmem:[%s929_s4 + $0x2] sm:$0x1]  ;;  %v478_v20 = vld [vmem:[%s929_s4 + $0x3] sm:$0x1]  ;;  %s332_s16 = sadd.s32 %s743_s15, %s495_s27 }
  0x51   : > { %s936_s30 = sld [smem:[#allocation7]]  ;;  %v294_v27 = vld [vmem:[%s929_s4] sm:$0x1]  ;;  %v483_v30 = vld [vmem:[%s929_s4 + $0x1] sm:$0x1]  ;;  %s319_s15 = scalar_lea.sflag [#allocation4], %s925_s21 }
  0x52   : > { %s473_s9 = sld [smem:[#allocation2 + $0x80]]  ;;  %v485_v33 = vld [vmem:[%s929_s4 + $0x2] sm:$0x1]  ;;  %v487_v37 = vld [vmem:[%s929_s4 + $0x3] sm:$0x1] }
  0x53   : > { %v246_v2 = vstv %s245_s11  ;;  %s475_s24 = sld [smem:[#allocation2 + $0x81]]  ;;  %s243_s11 = scalar_lea.vmem [#allocation9], %s494_s6 }
  0x54   : > { %v247_v4 = vmul.f32 %v246_v2, %v244_v0  ;;  %v251_v5 = vstv %s468_s23  ;;  %s477_s10 = sld [smem:[#allocation2 + $0x82]]  ;;  %s335_s23 = sshll.u32 %s243_s11, 4  ;;  %s961_s23 = int_to_ptr.vmem [resolvable:$true] %s335_s23 }
  0x55   : > { %v252_v7 = vmul.f32 %v467_v1, %v251_v5  ;;  %v257_v8 = vstv %s470_s29  ;;  %s479_s28 = sld [smem:[#allocation2 + $0x83]]  ;;  %s491_s29 = sshll.u32 %s332_s16, 4 }
  0x56   : > { %v258_v9 = vmul.f32 %v469_v3, %v257_v8  ;;  %v263_v10 = vstv %s472_s8  ;;  %s942_s5 = sld [smem:[#allocation7 + $0x1]] }
  0x57   : > { %v253_v12 = vadd.f32 %v252_v7, %v247_v4  ;;  %v264_v13 = vmul.f32 %v471_v6, %v263_v10  ;;  %s482_s7 = sld [smem:[#allocation2 + $0x100]]  ;;  %v267_v21 = vstv %s936_s30  ;;  %s966_s30 = scalar_lea.hbm %s1022_s3, %s491_s29 }
  0x58   : > { %v272_v15 = vstv %s473_s9  ;;  %s484_s1 = sld [smem:[#allocation2 + $0x101]]  ;;  %s655_s9 = scalar_lea.vmem %s961_s23, 48 }
  0x59   : > { %v259_v17 = vadd.f32 %v258_v9, %v253_v12  ;;  %v273_v18 = vmul.f32 %v272_v15, %v270_v11  ;;  %v276_v19 = vstv %s475_s24  ;;  %s486_s22 = sld [smem:[#allocation2 + $0x102]]  ;;  %p656_p3 = scmp.ne.s32.totalorder %s961_s23, %s655_s9 }
  0x5a   : > { %v277_v22 = vmul.f32 %v474_v14, %v276_v19  ;;  %v281_v23 = vstv %s477_s10  ;;  %s488_s26 = sld [smem:[#allocation2 + $0x103]]  ;;  %s767_s24 = smov [#allocation9]  }
  0x5b   : > { %v265_v24 = vadd.f32 %v264_v13, %v259_v17  ;;  %v282_v25 = vmul.f32 %v476_v16, %v281_v23  ;;  %v286_v26 = vstv %s479_s28  ;;  %s951_s0 = sld [smem:[#allocation7 + $0x2]]  ;;  %p657_p7 = pnand %p656_p3, %p849_p8 }
  0x5c   : > { %v278_v28 = vadd.f32 %v277_v22, %v273_v18  ;;  %v287_v29 = vmul.f32 %v478_v20, %v286_v26  ;;  %v290_v38 = vstv %s942_s5  ;;  %s659_s10 = sshll.u32 %s767_s24, 4  ;;  %s660_s10 = int_to_ptr.vmem [resolvable:$false] %s659_s10 }
  0x5d   : > { %v268_v31 = vadd.f32 %v267_v21, %v265_v24  ;;  %v296_v32 = vstv %s482_s7  ;;  %p658_p12 = pneg %p657_p7  ;;  %s661_s28 = scalar_lea.vmem %s660_s10, 96 }
  0x5e   : > { %v283_v34 = vadd.f32 %v282_v25, %v278_v28  ;;  %v297_v35 = vmul.f32 %v296_v32, %v294_v27  ;;  %v300_v36 = vstv %s484_s1  ;;  %p662_p1 = scmp.lt.s32.totalorder %s961_s23, %s660_s10  ;;  %p663_p2 = scmp.lt.s32.totalorder %s661_s28, %s655_s9 }
  0x5f   : > { %269 = vst [vmem:[%s243_s11] sm:$0x1] %v268_v31  ;;  %v301_v39 = vmul.f32 %v483_v30, %v300_v36  ;;  %v305_v40 = vstv %s486_s22 }
  0x60   : > { %v288_v41 = vadd.f32 %v287_v29, %v283_v34  ;;  %v306_v42 = vmul.f32 %v485_v33, %v305_v40  ;;  %v310_v43 = vstv %s488_s26  ;;  %p664_p5 = por %p663_p2, %p662_p1 }
  0x61   : > { %v302_v44 = vadd.f32 %v301_v39, %v297_v35  ;;  %v311_v45 = vmul.f32 %v487_v37, %v310_v43  ;;  %v314_v48 = vstv %s951_s0 }
  0x62   : > { %v291_v46 = vadd.f32 %v290_v38, %v288_v41  ;;  %p665_p6 = pnand %p664_p5, %p658_p12 }
  0x63   : > { %v307_v47 = vadd.f32 %v306_v42, %v302_v44 }
  0x64   : > { %481 = vst [vmem:[%s243_s11 + $0x1] sm:$0x1] %v291_v46 }
  0x65   : > { %v312_v49 = vadd.f32 %v311_v45, %v307_v47 }
  0x67   : > { %v315_v50 = vadd.f32 %v314_v48, %v312_v49 }
  0x69   : > { %490 = vst [vmem:[%s243_s11 + $0x2] sm:$0x1] %v315_v50 }
  0x6a   : > { %668 = shalt.err (!%p665_p6)
}
  0x6b   : > { %s669_s5 = scalar_lea.hbm %s966_s30, 48  ;;  %s673_s1 = scalar_lea.hbm %s1022_s3, 192 }
  0x6c   : > { %p670_p10 = scmp.ne.s32.totalorder %s966_s30, %s669_s5  ;;  %p674_p0 = scmp.lt.s32.totalorder %s966_s30, %s1022_s3 }
  0x6d   : > { %p675_p4 = scmp.lt.s32.totalorder %s673_s1, %s669_s5 }
  0x6e   : > { %p671_p11 = pnand %p670_p10, %p849_p8 }
  0x6f   : > { %p676_p9 = por %p675_p4, %p674_p0 }
  0x70   : > { %p672_p13 = pneg %p671_p11 }
  0x72   : > { %p677_p3 = pnand %p676_p9, %p672_p13 }
  0x74   : > { %680 = shalt.err (!%p677_p3)
}
  0x75   : > { %s768_s0 = smov 16   ;;  %s769_s27 = smov 32  }
  0x76   : > { %s770_s11 = smov 1  }
  0x77   : > { %506 = dma.vmem_to_hbm [thread:$0]  (%p849_p8), %s961_s23, 48, %s966_s30, %s319_s15, %s768_s0, %s769_s27, %s770_s11  }
  0x78 PF: > { %s1041_s16 = sld [smem:[#allocation14_spill]]  ;;  %p528_p7 = scmp.ge.s32.totalorder %s759_s19, 2 }
  0x79   : > { %s1042_s29 = sld [smem:[#allocation15_spill]] }
  0x7e   : > { %s350_s4 = sand.u32 1, %s1041_s16  }
  0x7f   : > { %p1043_p12 = scmp.ne.s32.totalorder %s1042_s29, 0  ;;  %s351_s8 = scalar_lea.sflag [#allocation4], %s350_s4 }
  0x81   : > { %p520_p1 = pnand %p528_p7, %p1043_p12 }
  0x83   : > { %p521_p2 = pneg %p520_p1 }
  0x85   : > { %726 = dma.done.wait (%p521_p2), %s351_s8, 48  }
  0x86   : > { %728 = vsyncadd (%p521_p2), %s351_s8, 4294967248  ;;  %s21_s19 = sadd.s32 1, %s759_s19   ;;  %s1044_s25 = smov %s908_s12 }
  0x87   : > { %p18_p5 = scmp.ge.s32.totalorder %s21_s19, 6   ;;  %s1045_s21 = sld [smem:[#allocation16_spill]] }
  0x88   : > { %s1046_s12 = smov %s735_s13  ;;  %s1047_s13 = smov %s739_s14 }
  0x89   : > { %s1048_s14 = smov %s1044_s25  ;;  %s1049_s15 = smov %s751_s17 }
  0x8a   : > { %s1050_s16 = smov %s755_s18  ;;  %s1052_s18 = smov %s1058_s20 }
  0x8b   :  { %20 = sbr.rel (!%p18_p5) target bundleno = 12 (0xc), region = 92 }
  0x8d   : > { %s1051_s17 = smov %s1045_s21 }
  0x90   :  { %356 = vsyncpa [#allocation3], 1 }
  0x91   :  { %358 = vsyncpa [#allocation3 + $0x1], 1 }
  0x92   :  { %359 = vsyncpa [#allocation4], 1 }
  0x93   :  { %361 = vsyncpa [#allocation4 + $0x1], 1 }
  0x94   :  { %362 = vsyncpa [#allocation5], 1 }
  0x95   :  { %364 = vsyncpa [#allocation5 + $0x1], 1 }
  0x96   :  { %365 = vsyncpa [#allocation6], 1 }
  0x97   :  { %367 = vsyncpa [#allocation6 + $0x1], 1 }

</bundles_post_ra>
